<compile_context>
chip_gen: v5e
topology: v5e:2x2
jax: 0.10.0
libtpu: 0.0.40
codegen_flags: <defaults>
</compile_context>

<pallas_src>
import jax
import jax.numpy as jnp
from jax.experimental import pallas as pl
from jax.experimental.pallas import tpu as pltpu

INPUT_VECTOR = 5   # module's `input_vector`
NB_ACTION = 3      # module's `nb_action`
HIDDEN = (64, 32, 16, 8)
TB = 256           # batch tile on the lane dimension (multiple of 128)


def _mlp_kernel(x_ref,
                w1_ref, b1_ref,
                w2_ref, b2_ref,
                w3_ref, b3_ref,
                w4_ref, b4_ref,
                w5_ref, b5_ref,
                o_ref):
    """Fused forward: relu, relu, relu, sigmoid, linear.

    All tensors are [features, batch_tile]; weights [out, in]; biases [out, 1].
    """
    h = x_ref[...]                                               # [5,  TB]

    h = jnp.dot(w1_ref[...], h, preferred_element_type=jnp.float32) + b1_ref[...]
    h = jnp.maximum(h, 0.0)                                      # relu(fc1in)  [64, TB]

    h = jnp.dot(w2_ref[...], h, preferred_element_type=jnp.float32) + b2_ref[...]
    h = jnp.maximum(h, 0.0)                                      # relu(fc2)    [32, TB]

    h = jnp.dot(w3_ref[...], h, preferred_element_type=jnp.float32) + b3_ref[...]
    h = jnp.maximum(h, 0.0)                                      # relu(fc3)    [16, TB]

    h = jnp.dot(w4_ref[...], h, preferred_element_type=jnp.float32) + b4_ref[...]
    h = jax.nn.sigmoid(h)                                        # sigmoid(fc4) [8,  TB]

    q = jnp.dot(w5_ref[...], h, preferred_element_type=jnp.float32) + b5_ref[...]
    o_ref[...] = q                                               # fc5out       [3,  TB]


def nn_forward(state, params, *, tb=TB):
    """state: [B, INPUT_VECTOR] f32 -> q_values: [B, NB_ACTION] f32."""
    B = state.shape[0]
    n_tiles = pl.cdiv(B, tb)
    b_pad = n_tiles * tb

    # Transpose once outside the kernel so batch is on lanes; pad batch to a
    # multiple of the tile so every store in the kernel is lane-dense.
    x_t = state.T                                                # [5, B]
    if b_pad != B:
        x_t = jnp.pad(x_t, ((0, 0), (0, b_pad - B)))

    flat = []
    param_specs = []
    for (w, b) in params:
        flat += [w, b]
        # Full-extent blocks, same block index every grid step -> VMEM resident.
        param_specs.append(pl.BlockSpec(w.shape, lambda i: (0, 0)))
        param_specs.append(pl.BlockSpec(b.shape, lambda i: (0, 0)))

    in_specs = [pl.BlockSpec((INPUT_VECTOR, tb), lambda i: (0, i))] + param_specs
    out_specs = pl.BlockSpec((NB_ACTION, tb), lambda i: (0, i))

    dims = (INPUT_VECTOR,) + HIDDEN + (NB_ACTION,)
    flops = 2 * b_pad * sum(dims[i] * dims[i + 1] for i in range(len(dims) - 1))
    param_bytes = sum(w.size + b.size for (w, b) in params) * 4
    bytes_accessed = b_pad * (INPUT_VECTOR + NB_ACTION) * 4 + param_bytes

    out = pl.pallas_call(
        _mlp_kernel,
        out_shape=jax.ShapeDtypeStruct((NB_ACTION, b_pad), jnp.float32),
        grid=(n_tiles,),
        in_specs=in_specs,
        out_specs=out_specs,
        compiler_params=pltpu.CompilerParams(
            # Batch axis is independent per tile -> shard across TCs on v7x.
            dimension_semantics=("parallel",),
            vmem_limit_bytes=32 * 1024 * 1024,
        ),
        cost_estimate=pl.CostEstimate(
            flops=flops,
            transcendentals=b_pad * HIDDEN[-1],   # sigmoid on the 8-wide layer
            bytes_accessed=bytes_accessed,
        ),
    )(x_t, *flat)

    # Drop batch padding and return to the module's [B, NB_ACTION] layout.
    return out[:, :B].T


def init_params(key):
    """PyTorch-Linear-style U(-1/sqrt(fan_in), +) init.

    Weights are [fan_out, fan_in] (PyTorch layout), biases [fan_out, 1].
    """
    dims = (INPUT_VECTOR,) + HIDDEN + (NB_ACTION,)
    params = []
    for i in range(len(dims) - 1):
        fan_in, fan_out = dims[i], dims[i + 1]
        key, kw, kb = jax.random.split(key, 3)
        bound = 1.0 / jnp.sqrt(jnp.float32(fan_in))
        w = jax.random.uniform(kw, (fan_out, fan_in), jnp.float32, -bound, bound)
        b = jax.random.uniform(kb, (fan_out, 1), jnp.float32, -bound, bound)
        params.append((w, b))
    return params


def reference_forward(state, params):
    """Pure-JAX reference (row-major activations) for a sanity check."""
    (w1, b1), (w2, b2), (w3, b3), (w4, b4), (w5, b5) = params
    h = jnp.maximum(state @ w1.T + b1.T, 0.0)
    h = jnp.maximum(h @ w2.T + b2.T, 0.0)
    h = jnp.maximum(h @ w3.T + b3.T, 0.0)
    h = jax.nn.sigmoid(h @ w4.T + b4.T)
    return h @ w5.T + b5.T


if __name__ == "__main__":
    key = jax.random.PRNGKey(0)
    key, kx = jax.random.split(key)

    batch = 8
    state = jax.random.normal(kx, (batch, INPUT_VECTOR), jnp.float32)
    params = init_params(key)

    q_values = nn_forward(state, params)
    q_values = jax.block_until_ready(q_values)

    ref = reference_forward(state, params)
    assert q_values.shape == (batch, NB_ACTION)
    assert jnp.allclose(q_values, ref, atol=1e-5, rtol=1e-5)

    print("KERNEL_OK")
</pallas_src>

<mosaic_0001>
module attributes {stable_mosaic.version = 11 : i64} {
  func.func @_mlp_kernel(%arg0: i32, %arg1: memref<5x256xf32, #tpu.memory_space<vmem>>, %arg2: memref<64x5xf32, #tpu.memory_space<vmem>>, %arg3: memref<64x1xf32, #tpu.memory_space<vmem>>, %arg4: memref<32x64xf32, #tpu.memory_space<vmem>>, %arg5: memref<32x1xf32, #tpu.memory_space<vmem>>, %arg6: memref<16x32xf32, #tpu.memory_space<vmem>>, %arg7: memref<16x1xf32, #tpu.memory_space<vmem>>, %arg8: memref<8x16xf32, #tpu.memory_space<vmem>>, %arg9: memref<8x1xf32, #tpu.memory_space<vmem>>, %arg10: memref<3x8xf32, #tpu.memory_space<vmem>>, %arg11: memref<3x1xf32, #tpu.memory_space<vmem>>, %arg12: memref<3x256xf32, #tpu.memory_space<vmem>>) attributes {dimension_semantics = [#tpu.dimension_semantics<parallel>], iteration_bounds = array<i64: 1>, scalar_prefetch = 0 : i64, scratch_operands = 0 : i64, tpu.core_type = #tpu.core_type<tc>, window_params = [{transform_indices = @transform_0, window_bounds = array<i64: 5, 256>}, {pipeline_mode = #tpu.pipeline_mode<synchronous>, transform_indices = @transform_1, window_bounds = array<i64: 64, 5>}, {pipeline_mode = #tpu.pipeline_mode<synchronous>, transform_indices = @transform_2, window_bounds = array<i64: 64, 1>}, {pipeline_mode = #tpu.pipeline_mode<synchronous>, transform_indices = @transform_3, window_bounds = array<i64: 32, 64>}, {pipeline_mode = #tpu.pipeline_mode<synchronous>, transform_indices = @transform_4, window_bounds = array<i64: 32, 1>}, {pipeline_mode = #tpu.pipeline_mode<synchronous>, transform_indices = @transform_5, window_bounds = array<i64: 16, 32>}, {pipeline_mode = #tpu.pipeline_mode<synchronous>, transform_indices = @transform_6, window_bounds = array<i64: 16, 1>}, {pipeline_mode = #tpu.pipeline_mode<synchronous>, transform_indices = @transform_7, window_bounds = array<i64: 8, 16>}, {pipeline_mode = #tpu.pipeline_mode<synchronous>, transform_indices = @transform_8, window_bounds = array<i64: 8, 1>}, {pipeline_mode = #tpu.pipeline_mode<synchronous>, transform_indices = @transform_9, window_bounds = array<i64: 3, 8>}, {pipeline_mode = #tpu.pipeline_mode<synchronous>, transform_indices = @transform_10, window_bounds = array<i64: 3, 1>}, {transform_indices = @transform_11, window_bounds = array<i64: 3, 256>}]} {
    %c0 = arith.constant 0 : index
    %c0_0 = arith.constant 0 : index
    %0 = vector.load %arg1[%c0, %c0_0] : memref<5x256xf32, #tpu.memory_space<vmem>>, vector<5x256xf32>
    %c0_1 = arith.constant 0 : index
    %c0_2 = arith.constant 0 : index
    %1 = vector.load %arg2[%c0_1, %c0_2] : memref<64x5xf32, #tpu.memory_space<vmem>>, vector<64x5xf32>
    %cst = arith.constant dense<0.000000e+00> : vector<64x256xf32>
    %2 = tpu.matmul %1, %0, %cst {dimension_numbers = #tpu.dot_dimension_numbers<[1], [0], [0], [1], [0, 0, 1, 1], [], []>} : vector<64x5xf32>, vector<5x256xf32>, vector<64x256xf32> -> vector<64x256xf32>
    %c0_3 = arith.constant 0 : index
    %c0_4 = arith.constant 0 : index
    %3 = vector.load %arg3[%c0_3, %c0_4] : memref<64x1xf32, #tpu.memory_space<vmem>>, vector<64x1xf32>
    %4 = vector.broadcast %3 : vector<64x1xf32> to vector<64x256xf32>
    %5 = arith.addf %2, %4 : vector<64x256xf32>
    %cst_5 = arith.constant 0.000000e+00 : f32
    %6 = vector.broadcast %cst_5 : f32 to vector<64x256xf32>
    %7 = arith.maximumf %5, %6 : vector<64x256xf32>
    %c0_6 = arith.constant 0 : index
    %c0_7 = arith.constant 0 : index
    %8 = vector.load %arg4[%c0_6, %c0_7] : memref<32x64xf32, #tpu.memory_space<vmem>>, vector<32x64xf32>
    %cst_8 = arith.constant dense<0.000000e+00> : vector<32x256xf32>
    %9 = tpu.matmul %8, %7, %cst_8 {dimension_numbers = #tpu.dot_dimension_numbers<[1], [0], [0], [1], [0, 0, 1, 1], [], []>} : vector<32x64xf32>, vector<64x256xf32>, vector<32x256xf32> -> vector<32x256xf32>
    %c0_9 = arith.constant 0 : index
    %c0_10 = arith.constant 0 : index
    %10 = vector.load %arg5[%c0_9, %c0_10] : memref<32x1xf32, #tpu.memory_space<vmem>>, vector<32x1xf32>
    %11 = vector.broadcast %10 : vector<32x1xf32> to vector<32x256xf32>
    %12 = arith.addf %9, %11 : vector<32x256xf32>
    %cst_11 = arith.constant 0.000000e+00 : f32
    %13 = vector.broadcast %cst_11 : f32 to vector<32x256xf32>
    %14 = arith.maximumf %12, %13 : vector<32x256xf32>
    %c0_12 = arith.constant 0 : index
    %c0_13 = arith.constant 0 : index
    %15 = vector.load %arg6[%c0_12, %c0_13] : memref<16x32xf32, #tpu.memory_space<vmem>>, vector<16x32xf32>
    %cst_14 = arith.constant dense<0.000000e+00> : vector<16x256xf32>
    %16 = tpu.matmul %15, %14, %cst_14 {dimension_numbers = #tpu.dot_dimension_numbers<[1], [0], [0], [1], [0, 0, 1, 1], [], []>} : vector<16x32xf32>, vector<32x256xf32>, vector<16x256xf32> -> vector<16x256xf32>
    %c0_15 = arith.constant 0 : index
    %c0_16 = arith.constant 0 : index
    %17 = vector.load %arg7[%c0_15, %c0_16] : memref<16x1xf32, #tpu.memory_space<vmem>>, vector<16x1xf32>
    %18 = vector.broadcast %17 : vector<16x1xf32> to vector<16x256xf32>
    %19 = arith.addf %16, %18 : vector<16x256xf32>
    %cst_17 = arith.constant 0.000000e+00 : f32
    %20 = vector.broadcast %cst_17 : f32 to vector<16x256xf32>
    %21 = arith.maximumf %19, %20 : vector<16x256xf32>
    %c0_18 = arith.constant 0 : index
    %c0_19 = arith.constant 0 : index
    %22 = vector.load %arg8[%c0_18, %c0_19] : memref<8x16xf32, #tpu.memory_space<vmem>>, vector<8x16xf32>
    %cst_20 = arith.constant dense<0.000000e+00> : vector<8x256xf32>
    %23 = tpu.matmul %22, %21, %cst_20 {dimension_numbers = #tpu.dot_dimension_numbers<[1], [0], [0], [1], [0, 0, 1, 1], [], []>} : vector<8x16xf32>, vector<16x256xf32>, vector<8x256xf32> -> vector<8x256xf32>
    %c0_21 = arith.constant 0 : index
    %c0_22 = arith.constant 0 : index
    %24 = vector.load %arg9[%c0_21, %c0_22] : memref<8x1xf32, #tpu.memory_space<vmem>>, vector<8x1xf32>
    %25 = vector.broadcast %24 : vector<8x1xf32> to vector<8x256xf32>
    %26 = arith.addf %23, %25 : vector<8x256xf32>
    %27 = arith.negf %26 : vector<8x256xf32>
    %28 = math.exp %27 : vector<8x256xf32>
    %cst_23 = arith.constant 1.000000e+00 : f32
    %29 = vector.broadcast %cst_23 : f32 to vector<8x256xf32>
    %30 = arith.addf %29, %28 : vector<8x256xf32>
    %31 = arith.divf %29, %30 : vector<8x256xf32>
    %c0_24 = arith.constant 0 : index
    %c0_25 = arith.constant 0 : index
    %32 = vector.load %arg10[%c0_24, %c0_25] : memref<3x8xf32, #tpu.memory_space<vmem>>, vector<3x8xf32>
    %cst_26 = arith.constant dense<0.000000e+00> : vector<3x256xf32>
    %33 = tpu.matmul %32, %31, %cst_26 {dimension_numbers = #tpu.dot_dimension_numbers<[1], [0], [0], [1], [0, 0, 1, 1], [], []>} : vector<3x8xf32>, vector<8x256xf32>, vector<3x256xf32> -> vector<3x256xf32>
    %c0_27 = arith.constant 0 : index
    %c0_28 = arith.constant 0 : index
    %34 = vector.load %arg11[%c0_27, %c0_28] : memref<3x1xf32, #tpu.memory_space<vmem>>, vector<3x1xf32>
    %35 = vector.broadcast %34 : vector<3x1xf32> to vector<3x256xf32>
    %36 = arith.addf %33, %35 : vector<3x256xf32>
    %c0_29 = arith.constant 0 : index
    %c0_30 = arith.constant 0 : index
    %37 = vector.load %arg12[%c0_29, %c0_30] : memref<3x256xf32, #tpu.memory_space<vmem>>, vector<3x256xf32>
    tpu.vector_store %arg12[%c0_29, %c0_30], %36 {strides = array<i32>} : memref<3x256xf32, #tpu.memory_space<vmem>>, vector<3x256xf32>,
    return
  }
  func.func @transform_0(%arg0: i32) -> (i32, i32) {
    %c0_i32 = arith.constant 0 : i32
    %c0_i32_0 = arith.constant 0 : i32
    return %c0_i32, %arg0 : i32, i32
  }
  func.func @transform_1(%arg0: i32) -> (i32, i32) {
    %c0_i32 = arith.constant 0 : i32
    %c0_i32_0 = arith.constant 0 : i32
    %c0_i32_1 = arith.constant 0 : i32
    return %c0_i32, %c0_i32_0 : i32, i32
  }
  func.func @transform_2(%arg0: i32) -> (i32, i32) {
    %c0_i32 = arith.constant 0 : i32
    %c0_i32_0 = arith.constant 0 : i32
    %c0_i32_1 = arith.constant 0 : i32
    return %c0_i32, %c0_i32_0 : i32, i32
  }
  func.func @transform_3(%arg0: i32) -> (i32, i32) {
    %c0_i32 = arith.constant 0 : i32
    %c0_i32_0 = arith.constant 0 : i32
    %c0_i32_1 = arith.constant 0 : i32
    return %c0_i32, %c0_i32_0 : i32, i32
  }
  func.func @transform_4(%arg0: i32) -> (i32, i32) {
    %c0_i32 = arith.constant 0 : i32
    %c0_i32_0 = arith.constant 0 : i32
    %c0_i32_1 = arith.constant 0 : i32
    return %c0_i32, %c0_i32_0 : i32, i32
  }
  func.func @transform_5(%arg0: i32) -> (i32, i32) {
    %c0_i32 = arith.constant 0 : i32
    %c0_i32_0 = arith.constant 0 : i32
    %c0_i32_1 = arith.constant 0 : i32
    return %c0_i32, %c0_i32_0 : i32, i32
  }
  func.func @transform_6(%arg0: i32) -> (i32, i32) {
    %c0_i32 = arith.constant 0 : i32
    %c0_i32_0 = arith.constant 0 : i32
    %c0_i32_1 = arith.constant 0 : i32
    return %c0_i32, %c0_i32_0 : i32, i32
  }
  func.func @transform_7(%arg0: i32) -> (i32, i32) {
    %c0_i32 = arith.constant 0 : i32
    %c0_i32_0 = arith.constant 0 : i32
    %c0_i32_1 = arith.constant 0 : i32
    return %c0_i32, %c0_i32_0 : i32, i32
  }
  func.func @transform_8(%arg0: i32) -> (i32, i32) {
    %c0_i32 = arith.constant 0 : i32
    %c0_i32_0 = arith.constant 0 : i32
    %c0_i32_1 = arith.constant 0 : i32
    return %c0_i32, %c0_i32_0 : i32, i32
  }
  func.func @transform_9(%arg0: i32) -> (i32, i32) {
    %c0_i32 = arith.constant 0 : i32
    %c0_i32_0 = arith.constant 0 : i32
    %c0_i32_1 = arith.constant 0 : i32
    return %c0_i32, %c0_i32_0 : i32, i32
  }
  func.func @transform_10(%arg0: i32) -> (i32, i32) {
    %c0_i32 = arith.constant 0 : i32
    %c0_i32_0 = arith.constant 0 : i32
    %c0_i32_1 = arith.constant 0 : i32
    return %c0_i32, %c0_i32_0 : i32, i32
  }
  func.func @transform_11(%arg0: i32) -> (i32, i32) {
    %c0_i32 = arith.constant 0 : i32
    %c0_i32_0 = arith.constant 0 : i32
    return %c0_i32, %arg0 : i32, i32
  }
}

</mosaic_0001>

<bundles_post_ra>
// kernel: tpu_custom_call.1
= control target key start
LH: loop header
LB: loop body
LE: loop exit
PB: predicated region body
PF: predicated region fallthrough
CT: control target
= control target key end

     0   :  { %vm122_vm0 = vcmask 1044480   ;;  %v643_v2 = vmov 0   ;;  %vm97_vm1 = vcmask 39936   ;;  %s826_s0 = inlined_call_operand.vmem [shape: f32[5,256], index: 0, kind: input, shape index: {}]   ;;  %s827_s1 = inlined_call_operand.vmem [shape: f32[64,5], index: 1, kind: input, shape index: {}]   ;;  %s828_s2 = inlined_call_operand.vmem [shape: f32[64,1], index: 2, kind: input, shape index: {}]   ;;  %s829_s3 = inlined_call_operand.vmem [shape: f32[32,64], index: 3, kind: input, shape index: {}]   ;;  %s830_s4 = inlined_call_operand.vmem [shape: f32[32,1], index: 4, kind: input, shape index: {}]   ;;  %s831_s5 = inlined_call_operand.vmem [shape: f32[16,32], index: 5, kind: input, shape index: {}]   ;;  %s832_s6 = inlined_call_operand.vmem [shape: f32[16,1], index: 6, kind: input, shape index: {}]   ;;  %s833_s7 = inlined_call_operand.vmem [shape: f32[8,16], index: 7, kind: input, shape index: {}]   ;;  %s834_s8 = inlined_call_operand.vmem [shape: f32[8,1], index: 8, kind: input, shape index: {}]   ;;  %s835_s9 = inlined_call_operand.vmem [shape: f32[3,8], index: 9, kind: input, shape index: {}]   ;;  %s836_s10 = inlined_call_operand.vmem [shape: f32[3,1], index: 10, kind: input, shape index: {}]   ;;  %s837_s11 = inlined_call_operand.hbm [shape: f32[3,256], index: 11, kind: output, shape index: {}]  }
   0x1   :  { %v39_v0 = vld [vmem:[%s826_s0] sm:$0x1f]  ;;  %v40_v1 = vld [vmem:[%s826_s0 + $0x8] sm:$0x1f]  ;;  %607 = vset.pattern.permute.xlu1 %v643_v2  ;;  %v56_v5 = vld [vmem:[%s828_s2 + $0x38] sm:$0xff]  ;;  %606 = vset.pattern.permute.xlu0 %v643_v2 }
   0x2   :  { %568 = vmatpush.msk.msra.mxu0 %vm122_vm0, %v39_v0  ;;  %v54_v3 = vld [vmem:[%s828_s2 + $0x28] sm:$0xff]  ;;  %v41_v4 = vld [vmem:[%s827_s1] sm:$0xff]  ;;  %577 = vmatpush.msk.msra.mxu1 %vm122_vm0, %v40_v1 }
   0x3   :  { %84 = vperm.xlu1 %607, %v54_v3   ;;  %569 = vmatmul.msk.f32.vlgmr.msra.gmra.mxu0 %vm97_vm1, %v41_v4 }
   0x4   :  { %578 = vmatmul.msk.f32.vlgmr.msra.gmra.mxu1 %vm97_vm1, %v41_v4  ;;  %608 = vset.pattern.permute.xlu2 %v643_v2 }
   0x5   :  { %94 = vperm.xlu0 %606, %v56_v5  }
   0x6   :  { %16 = vsyncpa [#allocation3], 0  ;;  %v53_v6 = vld [vmem:[%s828_s2 + $0x20] sm:$0xff]  ;;  %v42_v7 = vld [vmem:[%s827_s1 + $0x8] sm:$0xff]  ;;  %vm255_vm2 = vcmask 523264   ;;  %vm348_vm3 = vcmask 261120  }
   0x7   :  { %v55_v8 = vld [vmem:[%s828_s2 + $0x30] sm:$0xff]  ;;  %v52_v9 = vld [vmem:[%s828_s2 + $0x18] sm:$0xff]  ;;  %v49_v10 = vld [vmem:[%s828_s2] sm:$0xff]  ;;  %vm412_vm4 = vcmask 130048   ;;  %vm501_vm12 = vcmask 64512   ;;  %s644_s15 = smov [#allocation2]  }
   0x8   :  { %74 = vperm.xlu2 %608, %v52_v9   ;;  %v43_v11 = vld [vmem:[%s827_s1 + $0x10] sm:$0xff]  ;;  %v50_v12 = vld [vmem:[%s828_s2 + $0x8] sm:$0xff]  ;;  %v44_v14 = vld [vmem:[%s827_s1 + $0x18] sm:$0xff]  ;;  %s557_s16 = sshll.u32 %s644_s15, 4  ;;  %s559_s19 = sshll.u32 %s837_s11, 4  ;;  %vm548_vm14 = vcmask 1043456   ;;  %s558_s16 = int_to_ptr.vmem [resolvable:$true] %s557_s16  ;;  %s560_s19 = int_to_ptr.hbm [resolvable:$true] %s559_s19 }
   0x9   :  { %v51_v13 = vld [vmem:[%s828_s2 + $0x10] sm:$0xff]  ;;  %v232_v16 = vld [vmem:[%s830_s4 + $0x8] sm:$0xff]  ;;  %v234_v17 = vld [vmem:[%s830_s4 + $0x18] sm:$0xff] }
   0xa   :  { %v233_v15 = vld [vmem:[%s830_s4 + $0x10] sm:$0xff]  ;;  %v45_v18 = vld [vmem:[%s827_s1 + $0x20] sm:$0xff]  ;;  %v337_v20 = vld [vmem:[%s832_s6 + $0x8] sm:$0xff] }
   0xb   :  { %79 = vperm.xlu1 %607, %v53_v6   ;;  %570 = vmatmul.msk.f32.gmra.mxu0 %vm97_vm1, %v42_v7  ;;  %v336_v19 = vld [vmem:[%s832_s6] sm:$0xff]  ;;  %v46_v22 = vld [vmem:[%s827_s1 + $0x28] sm:$0xff]  ;;  %v47_v25 = vld [vmem:[%s827_s1 + $0x30] sm:$0xff] }
   0xc   :  { %579 = vmatmul.msk.f32.gmra.mxu1 %vm97_vm1, %v42_v7  ;;  %v231_v21 = vld [vmem:[%s830_s4] sm:$0xff]  ;;  %v48_v26 = vld [vmem:[%s827_s1 + $0x38] sm:$0xff] }
   0xd   :  { %89 = vperm.xlu0 %606, %v55_v8   ;;  %v495_v23 = vld [vmem:[%s836_s10] sm:$0x7] }
   0xe   :  { %v406_v24 = vld [vmem:[%s834_s8] sm:$0xff] }
  0x10   :  { %69 = vperm.xlu2 %608, %v51_v13  }
  0x13   :  { %59 = vperm.xlu1 %607, %v49_v10   ;;  %571 = vmatmul.msk.f32.gmra.mxu0 %vm97_vm1, %v43_v11 }
  0x14   :  { %580 = vmatmul.msk.f32.gmra.mxu1 %vm97_vm1, %v43_v11 }
  0x15   :  { %64 = vperm.xlu0 %606, %v50_v12  }
  0x18   :  { %252 = vperm.xlu2 %608, %v234_v17  }
  0x1b   :  { %572 = vmatmul.msk.f32.gmra.mxu0 %vm97_vm1, %v44_v14  ;;  %242 = vperm.xlu1 %607, %v232_v16  }
  0x1c   :  { %581 = vmatmul.msk.f32.gmra.mxu1 %vm97_vm1, %v44_v14 }
  0x1d   :  { %247 = vperm.xlu0 %606, %v233_v15  }
  0x20   :  { %237 = vperm.xlu2 %608, %v231_v21   ;;  %v229_v21 = vld [vmem:[%s829_s3 + $0x10] sm:$0xff] }
  0x23   :  { %573 = vmatmul.msk.f32.gmra.mxu0 %vm97_vm1, %v45_v18  ;;  %340 = vperm.xlu1 %607, %v336_v19   ;;  %v227_v19 = vld [vmem:[%s829_s3] sm:$0xff] }
  0x24   :  { %582 = vmatmul.msk.f32.gmra.mxu1 %vm97_vm1, %v45_v18 }
  0x25   :  { %345 = vperm.xlu0 %606, %v337_v20   ;;  %v228_v20 = vld [vmem:[%s829_s3 + $0x8] sm:$0xff] }
  0x28   :  { %409 = vperm.xlu2 %608, %v406_v24  }
  0x2b   :  { %574 = vmatmul.msk.f32.gmra.mxu0 %vm97_vm1, %v46_v22 }
  0x2c   :  { %583 = vmatmul.msk.f32.gmra.mxu1 %vm97_vm1, %v46_v22  ;;  %v230_v22 = vld [vmem:[%s829_s3 + $0x18] sm:$0xff] }
  0x2d   :  { %498 = vperm.xlu0 %606, %v495_v23  }
  0x33   :  { %575 = vmatmul.msk.f32.gmra.mxu0 %vm97_vm1, %v47_v25 }
  0x34   :  { %584 = vmatmul.msk.f32.gmra.mxu1 %vm97_vm1, %v47_v25 }
  0x3b   :  { %576 = vmatmul.msk.f32.gmra.mxu0 %vm97_vm1, %v48_v26 }
  0x3c   :  { %585 = vmatmul.msk.f32.gmra.mxu1 %vm97_vm1, %v48_v26 }
  0x62   :  { %v75_v43 = vpop.permute.xlu2 %74 }
  0x6a   :  { %v70_v60 = vpop.permute.xlu2 %69 }
  0x75   :  { %v85_v40 = vpop.permute.xlu1 %84 }
  0x77   :  { %v95_v39 = vpop.permute.xlu0 %94 }
  0x7d   :  { %v80_v45 = vpop.permute.xlu1 %79 }
  0x7f   :  { %v90_v44 = vpop.permute.xlu0 %89 }
  0x80   :  { %v146_v27 = vpop.f32.mrf.mxu0 }
  0x81   :  { %v187_v28 = vpop.f32.mrf.mxu1 }
  0x85   :  { %v60_v6 = vpop.permute.xlu1 %59 }
  0x86   :  { %v147_v11 = vadd.f32 %v146_v27, %v60_v6  ;;  %v188_v12 = vadd.f32 %v187_v28, %v60_v6 }
  0x87   :  { %v65_v1 = vpop.permute.xlu0 %64 }
  0x88   :  { %v149_v29 = vpop.f32.mrf.mxu0  ;;  %v211_v17 = vmax.f32 %v147_v11, 0.0  ;;  %v212_v18 = vmax.f32 %v188_v12, 0.0 }
  0x89   :  { %v190_v30 = vpop.f32.mrf.mxu1  ;;  %v150_v7 = vadd.f32 %v149_v29, %v65_v1  ;;  %v253_v29 = vpop.permute.xlu2 %252 }
  0x8a   :  { %v191_v8 = vadd.f32 %v190_v30, %v65_v1 }
  0x8b   :  { %v213_v15 = vmax.f32 %v150_v7, 0.0 }
  0x8c   :  { %v214_v16 = vmax.f32 %v191_v8, 0.0 }
  0x8f   :  { %v248_v30 = vpop.permute.xlu0 %247 }
  0x90   :  { %v152_v31 = vpop.f32.mrf.mxu0 }
  0x91   :  { %v193_v32 = vpop.f32.mrf.mxu1  ;;  %v153_v2 = vadd.f32 %v152_v31, %v70_v60 }
  0x92   :  { %v194_v3 = vadd.f32 %v193_v32, %v70_v60 }
  0x93   :  { %v215_v13 = vmax.f32 %v153_v2, 0.0 }
  0x94   :  { %v216_v14 = vmax.f32 %v194_v3, 0.0  ;;  %v405_v3 = vld [vmem:[%s833_s7] sm:$0xff] }
  0x98   :  { %v155_v33 = vpop.f32.mrf.mxu0 }
  0x99   :  { %v196_v34 = vpop.f32.mrf.mxu1  ;;  %v156_v61 = vadd.f32 %v155_v33, %v75_v43 }
  0x9a   :  { %v197_v62 = vadd.f32 %v196_v34, %v75_v43 }
  0x9b   :  { %v217_v9 = vmax.f32 %v156_v61, 0.0 }
  0x9c   :  { %v218_v10 = vmax.f32 %v197_v62, 0.0 }
  0xa0   :  { %v158_v35 = vpop.f32.mrf.mxu0 }
  0xa1   :  { %v199_v36 = vpop.f32.mrf.mxu1  ;;  %v159_v56 = vadd.f32 %v158_v35, %v80_v45 }
  0xa2   :  { %v200_v57 = vadd.f32 %v199_v36, %v80_v45 }
  0xa3   :  { %v219_v4 = vmax.f32 %v159_v56, 0.0 }
  0xa4   :  { %v220_v5 = vmax.f32 %v200_v57, 0.0 }
  0xa8   :  { %v161_v37 = vpop.f32.mrf.mxu0 }
  0xa9   :  { %v202_v38 = vpop.f32.mrf.mxu1  ;;  %v162_v52 = vadd.f32 %v161_v37, %v85_v40  ;;  %v243_v37 = vpop.permute.xlu1 %242 }
  0xaa   :  { %v203_v53 = vadd.f32 %v202_v38, %v85_v40 }
  0xab   :  { %v221_v63 = vmax.f32 %v162_v52, 0.0  ;;  %v335_v52 = vld [vmem:[%s831_s5 + $0x8] sm:$0xff] }
  0xac   :  { %v222_v0 = vmax.f32 %v203_v53, 0.0 }
  0xb0   :  { %v164_v41 = vpop.f32.mrf.mxu0 }
  0xb1   :  { %v205_v42 = vpop.f32.mrf.mxu1  ;;  %v165_v48 = vadd.f32 %v164_v41, %v90_v44  ;;  %v341_v56 = vpop.permute.xlu1 %340 }
  0xb2   :  { %v206_v49 = vadd.f32 %v205_v42, %v90_v44  ;;  %v238_v42 = vpop.permute.xlu2 %237 }
  0xb3   :  { %v223_v58 = vmax.f32 %v165_v48, 0.0 }
  0xb4   :  { %v224_v59 = vmax.f32 %v206_v49, 0.0 }
  0xb8   :  { %v167_v46 = vpop.f32.mrf.mxu0 }
  0xb9   :  { %v208_v47 = vpop.f32.mrf.mxu1  ;;  %v168_v50 = vadd.f32 %v167_v46, %v95_v39 }
  0xba   :  { %v209_v51 = vadd.f32 %v208_v47, %v95_v39 }
  0xbb   :  { %v225_v54 = vmax.f32 %v168_v50, 0.0 }
  0xbc   :  { %v226_v55 = vmax.f32 %v209_v51, 0.0  ;;  %v334_v51 = vld [vmem:[%s831_s5] sm:$0xff] }
  0xbd   :  { %276 = vmatpush.msra.mxu2 %v225_v54 }
  0xbe   :  { %305 = vmatpush.msra.mxu3 %v226_v55  ;;  %v346_v55 = vpop.permute.xlu0 %345 }
  0xbf   :  { %277 = vmatpush.msra.mxu2 %v223_v58 }
  0xc0   :  { %306 = vmatpush.msra.mxu3 %v224_v59 }
  0xc1   :  { %278 = vmatpush.msra.mxu2 %v221_v63 }
  0xc2   :  { %307 = vmatpush.msra.mxu3 %v222_v0 }
  0xc3   :  { %279 = vmatpush.msra.mxu2 %v219_v4  ;;  %v410_v4 = vpop.permute.xlu2 %409 }
  0xc4   :  { %308 = vmatpush.msra.mxu3 %v220_v5 }
  0xc5   :  { %280 = vmatpush.msra.mxu2 %v217_v9 }
  0xc6   :  { %309 = vmatpush.msra.mxu3 %v218_v10 }
  0xc7   :  { %281 = vmatpush.msra.mxu2 %v215_v13 }
  0xc8   :  { %310 = vmatpush.msra.mxu3 %v216_v14 }
  0xc9   :  { %282 = vmatpush.msra.mxu2 %v213_v15 }
  0xca   :  { %311 = vmatpush.msra.mxu3 %v214_v16 }
  0xcb   :  { %283 = vmatpush.msra.mxu2 %v211_v17 }
  0xcc   :  { %312 = vmatpush.msra.mxu3 %v212_v18  ;;  %586 = vmatmul.msk.f32.vlgmr.msra.gmra.mxu2 %vm255_vm2, %v227_v19 }
  0xcd   :  { %590 = vmatmul.msk.f32.vlgmr.msra.gmra.mxu3 %vm255_vm2, %v227_v19 }
  0xd4   :  { %587 = vmatmul.msk.f32.gmra.mxu2 %vm255_vm2, %v228_v20 }
  0xd5   :  { %591 = vmatmul.msk.f32.gmra.mxu3 %vm255_vm2, %v228_v20 }
  0xdc   :  { %588 = vmatmul.msk.f32.gmra.mxu2 %vm255_vm2, %v229_v21 }
  0xdd   :  { %592 = vmatmul.msk.f32.gmra.mxu3 %vm255_vm2, %v229_v21 }
  0xe4   :  { %589 = vmatmul.msk.f32.gmra.mxu2 %vm255_vm2, %v230_v22 }
  0xe5   :  { %593 = vmatmul.msk.f32.gmra.mxu3 %vm255_vm2, %v230_v22 }
 0x14f   :  { %v285_v23 = vpop.f32.mrf.mxu2 }
 0x150   :  { %v314_v24 = vpop.f32.mrf.mxu3  ;;  %v286_v43 = vadd.f32 %v285_v23, %v238_v42 }
 0x151   :  { %v315_v44 = vadd.f32 %v314_v24, %v238_v42 }
 0x152   :  { %v326_v49 = vmax.f32 %v286_v43, 0.0 }
 0x153   :  { %v327_v50 = vmax.f32 %v315_v44, 0.0 }
 0x157   :  { %v288_v25 = vpop.f32.mrf.mxu2 }
 0x158   :  { %v317_v26 = vpop.f32.mrf.mxu3  ;;  %v289_v38 = vadd.f32 %v288_v25, %v243_v37 }
 0x159   :  { %v318_v39 = vadd.f32 %v317_v26, %v243_v37 }
 0x15a   :  { %v328_v47 = vmax.f32 %v289_v38, 0.0 }
 0x15b   :  { %v329_v48 = vmax.f32 %v318_v39, 0.0 }
 0x15f   :  { %v291_v27 = vpop.f32.mrf.mxu2 }
 0x160   :  { %v320_v28 = vpop.f32.mrf.mxu3  ;;  %v292_v33 = vadd.f32 %v291_v27, %v248_v30 }
 0x161   :  { %v321_v34 = vadd.f32 %v320_v28, %v248_v30 }
 0x162   :  { %v330_v45 = vmax.f32 %v292_v33, 0.0 }
 0x163   :  { %v331_v46 = vmax.f32 %v321_v34, 0.0 }
 0x167   :  { %v294_v31 = vpop.f32.mrf.mxu2 }
 0x168   :  { %v323_v32 = vpop.f32.mrf.mxu3  ;;  %v295_v35 = vadd.f32 %v294_v31, %v253_v29 }
 0x169   :  { %v324_v36 = vadd.f32 %v323_v32, %v253_v29  ;;  %v494_v32 = vld [vmem:[%s835_s9] sm:$0x7] }
 0x16a   :  { %v332_v40 = vmax.f32 %v295_v35, 0.0 }
 0x16b   :  { %v333_v41 = vmax.f32 %v324_v36, 0.0  ;;  %v499_v36 = vpop.permute.xlu0 %498 }
 0x16c   :  { %367 = vmatpush.msrb.mxu2 %v332_v40 }
 0x16d   :  { %390 = vmatpush.msrb.mxu3 %v333_v41 }
 0x16e   :  { %368 = vmatpush.msrb.mxu2 %v330_v45 }
 0x16f   :  { %391 = vmatpush.msrb.mxu3 %v331_v46 }
 0x170   :  { %369 = vmatpush.msrb.mxu2 %v328_v47 }
 0x171   :  { %392 = vmatpush.msrb.mxu3 %v329_v48 }
 0x172   :  { %370 = vmatpush.msrb.mxu2 %v326_v49 }
 0x173   :  { %393 = vmatpush.msrb.mxu3 %v327_v50  ;;  %594 = vmatmul.msk.f32.vlgmr.msrb.gmra.mxu2 %vm348_vm3, %v334_v51 }
 0x174   :  { %596 = vmatmul.msk.f32.vlgmr.msrb.gmra.mxu3 %vm348_vm3, %v334_v51 }
 0x17b   :  { %595 = vmatmul.msk.f32.gmra.mxu2 %vm348_vm3, %v335_v52 }
 0x17c   :  { %597 = vmatmul.msk.f32.gmra.mxu3 %vm348_vm3, %v335_v52 }
 0x1f6   :  { %v372_v53 = vpop.f32.mrf.mxu2 }
 0x1f7   :  { %v395_v54 = vpop.f32.mrf.mxu3  ;;  %v373_v59 = vadd.f32 %v372_v53, %v341_v56 }
 0x1f8   :  { %v396_v60 = vadd.f32 %v395_v54, %v341_v56 }
 0x1f9   :  { %v401_v1 = vmax.f32 %v373_v59, 0.0 }
 0x1fa   :  { %v402_v2 = vmax.f32 %v396_v60, 0.0 }
 0x1fe   :  { %v375_v57 = vpop.f32.mrf.mxu2 }
 0x1ff   :  { %v398_v58 = vpop.f32.mrf.mxu3  ;;  %v376_v61 = vadd.f32 %v375_v57, %v346_v55 }
 0x200   :  { %v399_v62 = vadd.f32 %v398_v58, %v346_v55 }
 0x201   :  { %v403_v63 = vmax.f32 %v376_v61, 0.0 }
 0x202   :  { %v404_v0 = vmax.f32 %v399_v62, 0.0 }
 0x203   :  { %430 = vmatpush.msra.mxu2 %v403_v63 }
 0x204   :  { %450 = vmatpush.msra.mxu3 %v404_v0 }
 0x205   :  { %431 = vmatpush.msra.mxu2 %v401_v1 }
 0x206   :  { %451 = vmatpush.msra.mxu3 %v402_v2  ;;  %598 = vmatmul.msk.f32.vlgmr.msra.gmra.mxu2 %vm412_vm4, %v405_v3 }
 0x207   :  { %599 = vmatmul.msk.f32.vlgmr.msra.gmra.mxu3 %vm412_vm4, %v405_v3 }
 0x289   :  { %v433_v5 = vpop.f32.mrf.mxu2 }
 0x28a   :  { %v453_v6 = vpop.f32.mrf.mxu3  ;;  %v434_v7 = vadd.f32 %v433_v5, %v410_v4 }
 0x28b   :  { %v454_v8 = vadd.f32 %v453_v6, %v410_v4 }
 0x28c   :  { %v600_v9 = vmul.f32 -1.442695, %v434_v7 }
 0x28d   :  { %v601_v10 = vmul.f32 -1.442695, %v454_v8 }
 0x28e   :  { %609 = vpow2.f32 %v600_v9 }
 0x28f   :  { %611 = vpow2.f32 %v601_v10 }
 0x294   :  { %v610_v11 = vpop.eup %609 }
 0x295   :  { %v612_v12 = vpop.eup %611  ;;  %v462_v13 = vadd.f32 1.0, %v610_v11 }
 0x296   :  { %v463_v14 = vadd.f32 1.0, %v612_v12 }
 0x297   :  { %613 = vrcp.f32 %v462_v13  ;;  %v475_v20 = vand.u32 2147483648, %v462_v13  ;;  %v473_v23 = vand.u32 2147483647, %v462_v13  ;;  %vm469_vm7 = vweird.f32 %v462_v13 }
 0x298   :  { %615 = vrcp.f32 %v463_v14  ;;  %v490_v24 = vand.u32 2147483648, %v463_v14  ;;  %v488_v26 = vand.u32 2147483647, %v463_v14  ;;  %vm484_vm9 = vweird.f32 %v463_v14 }
 0x299   :  { %v476_v28 = vor.u32 1.1754944e-38, %v475_v20  ;;  %vm474_vm10 = vcmp.eq.f32.partialorder %v473_v23, 8.507059e+37 }
 0x29a   :  { %v491_v31 = vor.u32 1.1754944e-38, %v490_v24  ;;  %vm489_vm13 = vcmp.eq.f32.partialorder %v488_v26, 8.507059e+37 }
 0x29d   :  { %v614_v15 = vpop.eup %613 }
 0x29e   :  { %v616_v16 = vpop.eup %615  ;;  %v465_v17 = vmul.f32 %v614_v15, %v462_v13  ;;  %vm470_vm5 = vweird.f32 %v614_v15 }
 0x29f   :  { %v480_v18 = vmul.f32 %v616_v16, %v463_v14  ;;  %vm485_vm6 = vweird.f32 %v616_v16  ;;  %vm471_vm8 = vmor %vm469_vm7, %vm470_vm5 }
 0x2a0   :  { %v466_v19 = vsub.f32 1.0, %v465_v17  ;;  %vm486_vm11 = vmor %vm484_vm9, %vm485_vm6 }
 0x2a1   :  { %v481_v21 = vsub.f32 1.0, %v480_v18 }
 0x2a2   :  { %v467_v22 = vmul.f32 %v614_v15, %v466_v19 }
 0x2a3   :  { %v482_v25 = vmul.f32 %v616_v16, %v481_v21 }
 0x2a4   :  { %v468_v27 = vadd.f32 %v614_v15, %v467_v22 }
 0x2a5   :  { %v483_v29 = vadd.f32 %v616_v16, %v482_v25 }
 0x2a6   :  { %v472_v30 = vsel %vm471_vm8, %v614_v15, %v468_v27 }
 0x2a7   :  { %v477_v33 = vsel %vm474_vm10, %v476_v28, %v472_v30  ;;  %v487_v34 = vsel %vm486_vm11, %v616_v16, %v483_v29 }
 0x2a8   :  { %520 = vmatpush.msrb.mxu0 %v477_v33  ;;  %v492_v35 = vsel %vm489_vm13, %v491_v31, %v487_v34 }
 0x2a9   :  { %540 = vmatpush.msrb.mxu1 %v492_v35  ;;  %602 = vmatmul.msk.f32.vlgmr.msrb.gmra.mxu0 %vm501_vm12, %v494_v32 }
 0x2aa   :  { %603 = vmatmul.msk.f32.vlgmr.msrb.gmra.mxu1 %vm501_vm12, %v494_v32 }
 0x326   :  { %v522_v37 = vpop.f32.mrf.mxu0 }
 0x327   :  { %v542_v38 = vpop.f32.mrf.mxu1  ;;  %v523_v40 = vadd.f32 %v522_v37, %v499_v36 }
 0x328   :  { %v543_v39 = vadd.f32 %v542_v38, %v499_v36 }
 0x32a   :  { %v547_v41 = vrot.slane %v543_v39, 4 }
 0x32c   :  { %v549_v42 = vsel %vm548_vm14, %v523_v40, %v547_v41 }
 0x32d   :  { %551 = vst [vmem:[#allocation2] sm:$0x77] %v549_v42 }
 0x32e   :  { %562 = dma.vmem_to_hbm [thread:$0]  %s558_s16, 128, %s560_s19, [#allocation3]  }
 0x32f   :  { %641 = dma.done.wait [#allocation3], 128  }
 0x330   :  { %642 = vsyncadd [#allocation3], 4294967168 }
 0x331   :  { %567 = vsyncpa [#allocation3], 1 }

</bundles_post_ra>
